<compile_context>
chip_gen: v7x
topology: tpu7x:2x2x1
jax: 0.10.0
libtpu: 0.0.40
codegen_flags: <defaults>
</compile_context>

<pallas_src>
import functools

import jax
import jax.numpy as jnp
from jax.experimental import pallas as pl
from jax.experimental.pallas import tpu as pltpu


# ---------------------------------------------------------------------------
# Kernels
# ---------------------------------------------------------------------------
def mlp_kernel_resident(x_ref, w1_ref, b1_ref, w2_ref, b2_ref, o_ref):
    """Whole-weight-resident path: 1-D grid over row tiles."""
    x = x_ref[...].astype(jnp.bfloat16)
    h = jnp.dot(x, w1_ref[...], preferred_element_type=jnp.float32)
    # Bias + ReLU fused; downcast once to bf16 and feed the second MXU dot
    # directly (no f32 scratch round-trip).
    h = jnp.maximum(h + b1_ref[...], 0.0).astype(jnp.bfloat16)
    # Dropout: nn.Dropout() at inference is identity.
    # TODO(synk): training-mode dropout (p=0.5) needs pltpu.prng_seed /
    #             pltpu.prng_random_bits masking + 1/(1-p) rescale.
    y = jnp.dot(h, w2_ref[...], preferred_element_type=jnp.float32)
    o_ref[...] = jnp.maximum(y + b2_ref[...], 0.0).astype(o_ref.dtype)


def mlp_kernel_ktiled(x_ref, w1_ref, b1_ref, w2_ref, b2_ref, o_ref, acc_ref):
    """K(=4H)-tiled path: grid = (row tiles, K slabs); K axis is a reduction."""
    k = pl.program_id(1)

    @pl.when(k == 0)
    def _init():
        acc_ref[...] = jnp.zeros_like(acc_ref)

    x = x_ref[...].astype(jnp.bfloat16)
    # Slab of the first GEMM: (tm, tk) slice of the hidden activation.
    h = jnp.dot(x, w1_ref[...], preferred_element_type=jnp.float32)
    h = jnp.maximum(h + b1_ref[...], 0.0).astype(jnp.bfloat16)
    # Dropout is identity at inference (see TODO above).
    acc_ref[...] += jnp.dot(h, w2_ref[...], preferred_element_type=jnp.float32)

    @pl.when(k == pl.num_programs(1) - 1)
    def _finalize():
        o_ref[...] = jnp.maximum(acc_ref[...] + b2_ref[...], 0.0).astype(o_ref.dtype)


# ---------------------------------------------------------------------------
# VMEM budgeting / path selection helpers
# ---------------------------------------------------------------------------
def _device_vmem_bytes():
    try:
        return int(pltpu.get_tpu_info().vmem_capacity_bytes)
    except Exception:
        return 64 * (1 << 20)  # conservative fallback (v7x per-TC capacity)


def _pick_k_tile(H4):
    for tk in (1024, 512, 256, 128):
        if H4 % tk == 0:
            return tk
    return H4


def _resident_vmem_need(tm, H, H4, act_bytes, w_bytes):
    io = 2 * 2 * tm * H * act_bytes            # x + out row tiles, double-buffered
    weights = (H * H4 + H4 * H) * w_bytes      # single-buffered (pl.Buffered(1))
    biases = (H4 + H) * 4                      # f32, single-buffered
    h_tmp = tm * H4 * 2                        # bf16 intermediate (compiler temp)
    return io + weights + biases + h_tmp


def _ktiled_vmem_need(tm, tk, H, act_bytes, w_bytes):
    io = 2 * 2 * tm * H * act_bytes            # x + out row tiles, double-buffered
    weights = 2 * 2 * H * tk * w_bytes         # W1/W2 slabs, double-buffered
    biases = 2 * tk * 4 + H * 4
    acc = tm * H * 4                           # f32 accumulator scratch
    h_tmp = tm * tk * 2                        # bf16 intermediate slab
    return io + weights + biases + acc + h_tmp


def _vmem_limit(need, cap):
    # Generous budget (covers Mosaic internal scratch) but never above the
    # physical per-core capacity minus headroom (v7x: 64 MiB).
    return min(max(int(need * 1.5) + (2 << 20), 32 << 20), cap - (4 << 20))


# ---------------------------------------------------------------------------
# Wrapper
# ---------------------------------------------------------------------------
@functools.partial(jax.jit, static_argnames=("tm", "k_tile"))
def mlp_forward(x, w1, b1, w2, b2, *, tm=512, k_tile=None):
    """Computes relu(relu(x @ W1 + b1) @ W2 + b2); weights are pre-transposed."""
    M, H = x.shape
    H4 = w1.shape[1]

    # Pad the row count up to a multiple of tm (handles arbitrary token counts).
    Mp = pl.cdiv(M, tm) * tm
    xp = x if Mp == M else jnp.pad(x, ((0, Mp - M), (0, 0)))

    act_bytes = x.dtype.itemsize
    w_bytes = w1.dtype.itemsize
    vmem_cap = _device_vmem_bytes()

    cost = pl.CostEstimate(
        flops=4 * Mp * H * H4,                        # two GEMMs
        transcendentals=0,
        bytes_accessed=(Mp * H * act_bytes            # x
                        + (H * H4 + H4 * H) * w_bytes  # W1 + W2
                        + (H4 + H) * 4                 # b1 + b2
                        + Mp * H * act_bytes),         # out
    )

    single = pl.Buffered(1)  # grid-invariant operands: no double-buffering

    resident_need = _resident_vmem_need(tm, H, H4, act_bytes, w_bytes)
    use_resident = (k_tile is None) and (resident_need <= vmem_cap - (8 << 20))

    if use_resident:
        out = pl.pallas_call(
            mlp_kernel_resident,
            out_shape=jax.ShapeDtypeStruct((Mp, H), x.dtype),
            grid=(Mp // tm,),
            in_specs=[
                pl.BlockSpec((tm, H), lambda i: (i, 0)),                         # x tile
                pl.BlockSpec((H, H4), lambda i: (0, 0), pipeline_mode=single),   # W1
                pl.BlockSpec((1, H4), lambda i: (0, 0), pipeline_mode=single),   # b1
                pl.BlockSpec((H4, H), lambda i: (0, 0), pipeline_mode=single),   # W2
                pl.BlockSpec((1, H), lambda i: (0, 0), pipeline_mode=single),    # b2
            ],
            out_specs=pl.BlockSpec((tm, H), lambda i: (i, 0)),
            compiler_params=pltpu.CompilerParams(
                dimension_semantics=("parallel",),
                vmem_limit_bytes=_vmem_limit(resident_need, vmem_cap),
            ),
            cost_estimate=cost,
        )(xp, w1, b1, w2, b2)
    else:
        tk = _pick_k_tile(H4) if k_tile is None else int(k_tile)
        assert H4 % tk == 0, "k_tile must divide ratio * hidden_dims"
        need = _ktiled_vmem_need(tm, tk, H, act_bytes, w_bytes)
        out = pl.pallas_call(
            mlp_kernel_ktiled,
            out_shape=jax.ShapeDtypeStruct((Mp, H), x.dtype),
            grid=(Mp // tm, H4 // tk),
            in_specs=[
                pl.BlockSpec((tm, H), lambda i, k: (i, 0)),                       # x tile
                pl.BlockSpec((H, tk), lambda i, k: (0, k)),                       # W1 slab
                pl.BlockSpec((1, tk), lambda i, k: (0, k)),                       # b1 slab
                pl.BlockSpec((tk, H), lambda i, k: (k, 0)),                       # W2 slab
                pl.BlockSpec((1, H), lambda i, k: (0, 0), pipeline_mode=single),  # b2
            ],
            out_specs=pl.BlockSpec((tm, H), lambda i, k: (i, 0)),
            scratch_shapes=[pltpu.VMEM((tm, H), jnp.float32)],                    # acc
            compiler_params=pltpu.CompilerParams(
                dimension_semantics=("parallel", "arbitrary"),
                vmem_limit_bytes=_vmem_limit(need, vmem_cap),
            ),
            cost_estimate=cost,
        )(xp, w1, b1, w2, b2)

    return out[:M] if Mp != M else out


# ---------------------------------------------------------------------------
# Params / reference
# ---------------------------------------------------------------------------
def init_params(key, hidden_dims, ratio, w_dtype=jnp.bfloat16):
    """Mimics nn.Linear's uniform(-1/sqrt(fan_in), +1/sqrt(fan_in)) init.

    Weights are stored pre-transposed ((H,4H) and (4H,H)) and in bf16 for the
    MXU; biases stay in f32 (added after the f32 accumulation).
    """
    h, h4 = hidden_dims, ratio * hidden_dims
    k1, k2, k3, k4 = jax.random.split(key, 4)
    bound1 = 1.0 / jnp.sqrt(h)
    bound2 = 1.0 / jnp.sqrt(h4)
    w1 = jax.random.uniform(k1, (h, h4), jnp.float32, -bound1, bound1).astype(w_dtype)
    b1 = jax.random.uniform(k2, (1, h4), jnp.float32, -bound1, bound1)
    w2 = jax.random.uniform(k3, (h4, h), jnp.float32, -bound2, bound2).astype(w_dtype)
    b2 = jax.random.uniform(k4, (1, h), jnp.float32, -bound2, bound2)
    return w1, b1, w2, b2


def mlp_reference(x, w1, b1, w2, b2):
    """Pure-JAX reference mirroring the kernel's bf16-input / f32-accumulate math."""
    h = jnp.dot(x.astype(w1.dtype), w1, preferred_element_type=jnp.float32) + b1
    h = jnp.maximum(h, 0.0)
    y = jnp.dot(h.astype(w2.dtype), w2, preferred_element_type=jnp.float32) + b2
    return jnp.maximum(y, 0.0)


if __name__ == "__main__":
    # Small stand-in shapes (default module is hidden_dims=768, ratio=4; tune
    # tile sizes with the real 768/3072 shapes — H=128 under-fills v6e/v7x MXUs).
    hidden_dims = 128
    ratio = 4
    M = 500  # deliberately NOT a multiple of tm to exercise padding

    key = jax.random.PRNGKey(0)
    kx, kp = jax.random.split(key)
    x = jax.random.normal(kx, (M, hidden_dims), jnp.float32)
    w1, b1, w2, b2 = init_params(kp, hidden_dims, ratio)

    ref = mlp_reference(x, w1, b1, w2, b2)

    # Path 1: whole-weight-resident (auto-selected when weights fit in VMEM).
    out = jax.block_until_ready(mlp_forward(x, w1, b1, w2, b2, tm=128))
    assert out.shape == (M, hidden_dims)
    assert jnp.allclose(out, ref, atol=3e-3, rtol=3e-3), "resident path mismatch"

    # Path 2: K(=4H)-tiled reduction path (forced here; auto-selected for large
    # hidden_dims, e.g. on v7x's 64 MiB VMEM).
    out_kt = jax.block_until_ready(mlp_forward(x, w1, b1, w2, b2, tm=128, k_tile=128))
    assert jnp.allclose(out_kt, ref, atol=3e-3, rtol=3e-3), "k-tiled path mismatch"

    print("KERNEL_OK")
</pallas_src>

<mosaic_0001>
module attributes {stable_mosaic.version = 11 : i64} {
  func.func @mlp_kernel_resident(%arg0: i32, %arg1: memref<128x128xf32, #tpu.memory_space<vmem>>, %arg2: memref<128x512xbf16, #tpu.memory_space<vmem>>, %arg3: memref<1x512xf32, #tpu.memory_space<vmem>>, %arg4: memref<512x128xbf16, #tpu.memory_space<vmem>>, %arg5: memref<1x128xf32, #tpu.memory_space<vmem>>, %arg6: memref<128x128xf32, #tpu.memory_space<vmem>>) attributes {dimension_semantics = [#tpu.dimension_semantics<parallel>], iteration_bounds = array<i64: 4>, scalar_prefetch = 0 : i64, scratch_operands = 0 : i64, tpu.core_type = #tpu.core_type<tc>, window_params = [{transform_indices = @transform_0, window_bounds = array<i64: 128, 128>}, {pipeline_mode = #tpu.pipeline_mode<synchronous>, transform_indices = @transform_1, window_bounds = array<i64: 128, 512>}, {pipeline_mode = #tpu.pipeline_mode<synchronous>, transform_indices = @transform_2, window_bounds = array<i64: 1, 512>}, {pipeline_mode = #tpu.pipeline_mode<synchronous>, transform_indices = @transform_3, window_bounds = array<i64: 512, 128>}, {pipeline_mode = #tpu.pipeline_mode<synchronous>, transform_indices = @transform_4, window_bounds = array<i64: 1, 128>}, {transform_indices = @transform_5, window_bounds = array<i64: 128, 128>}]} {
    %c0 = arith.constant 0 : index
    %c0_0 = arith.constant 0 : index
    %0 = vector.load %arg1[%c0, %c0_0] : memref<128x128xf32, #tpu.memory_space<vmem>>, vector<128x128xf32>
    %1 = arith.truncf %0 : vector<128x128xf32> to vector<128x128xbf16>
    %c0_1 = arith.constant 0 : index
    %c0_2 = arith.constant 0 : index
    %2 = vector.load %arg2[%c0_1, %c0_2] : memref<128x512xbf16, #tpu.memory_space<vmem>>, vector<128x512xbf16>
    %cst = arith.constant dense<0.000000e+00> : vector<128x512xf32>
    %3 = tpu.matmul %1, %2, %cst {dimension_numbers = #tpu.dot_dimension_numbers<[1], [0], [0], [1], [0, 0, 1, 1], [], []>} : vector<128x128xbf16>, vector<128x512xbf16>, vector<128x512xf32> -> vector<128x512xf32>
    %c0_3 = arith.constant 0 : index
    %c0_4 = arith.constant 0 : index
    %4 = vector.load %arg3[%c0_3, %c0_4] : memref<1x512xf32, #tpu.memory_space<vmem>>, vector<1x512xf32>
    %5 = vector.broadcast %4 : vector<1x512xf32> to vector<128x512xf32>
    %6 = arith.addf %3, %5 : vector<128x512xf32>
    %cst_5 = arith.constant 0.000000e+00 : f32
    %7 = vector.broadcast %cst_5 : f32 to vector<128x512xf32>
    %8 = arith.maximumf %6, %7 : vector<128x512xf32>
    %9 = arith.truncf %8 : vector<128x512xf32> to vector<128x512xbf16>
    %c0_6 = arith.constant 0 : index
    %c0_7 = arith.constant 0 : index
    %10 = vector.load %arg4[%c0_6, %c0_7] : memref<512x128xbf16, #tpu.memory_space<vmem>>, vector<512x128xbf16>
    %cst_8 = arith.constant dense<0.000000e+00> : vector<128x128xf32>
    %11 = tpu.matmul %9, %10, %cst_8 {dimension_numbers = #tpu.dot_dimension_numbers<[1], [0], [0], [1], [0, 0, 1, 1], [], []>} : vector<128x512xbf16>, vector<512x128xbf16>, vector<128x128xf32> -> vector<128x128xf32>
    %c0_9 = arith.constant 0 : index
    %c0_10 = arith.constant 0 : index
    %12 = vector.load %arg5[%c0_9, %c0_10] : memref<1x128xf32, #tpu.memory_space<vmem>>, vector<1x128xf32>
    %13 = vector.broadcast %12 : vector<1x128xf32> to vector<128x128xf32>
    %14 = arith.addf %11, %13 : vector<128x128xf32>
    %cst_11 = arith.constant 0.000000e+00 : f32
    %15 = vector.broadcast %cst_11 : f32 to vector<128x128xf32>
    %16 = arith.maximumf %14, %15 : vector<128x128xf32>
    %c0_12 = arith.constant 0 : index
    %c0_13 = arith.constant 0 : index
    %17 = vector.load %arg6[%c0_12, %c0_13] : memref<128x128xf32, #tpu.memory_space<vmem>>, vector<128x128xf32>
    tpu.vector_store %arg6[%c0_12, %c0_13], %16 {strides = array<i32>} : memref<128x128xf32, #tpu.memory_space<vmem>>, vector<128x128xf32>,
    return
  }
  func.func @transform_0(%arg0: i32) -> (i32, i32) {
    %c0_i32 = arith.constant 0 : i32
    %c0_i32_0 = arith.constant 0 : i32
    return %arg0, %c0_i32 : i32, i32
  }
  func.func @transform_1(%arg0: i32) -> (i32, i32) {
    %c0_i32 = arith.constant 0 : i32
    %c0_i32_0 = arith.constant 0 : i32
    %c0_i32_1 = arith.constant 0 : i32
    return %c0_i32, %c0_i32_0 : i32, i32
  }
  func.func @transform_2(%arg0: i32) -> (i32, i32) {
    %c0_i32 = arith.constant 0 : i32
    %c0_i32_0 = arith.constant 0 : i32
    %c0_i32_1 = arith.constant 0 : i32
    return %c0_i32, %c0_i32_0 : i32, i32
  }
  func.func @transform_3(%arg0: i32) -> (i32, i32) {
    %c0_i32 = arith.constant 0 : i32
    %c0_i32_0 = arith.constant 0 : i32
    %c0_i32_1 = arith.constant 0 : i32
    return %c0_i32, %c0_i32_0 : i32, i32
  }
  func.func @transform_4(%arg0: i32) -> (i32, i32) {
    %c0_i32 = arith.constant 0 : i32
    %c0_i32_0 = arith.constant 0 : i32
    %c0_i32_1 = arith.constant 0 : i32
    return %c0_i32, %c0_i32_0 : i32, i32
  }
  func.func @transform_5(%arg0: i32) -> (i32, i32) {
    %c0_i32 = arith.constant 0 : i32
    %c0_i32_0 = arith.constant 0 : i32
    return %arg0, %c0_i32 : i32, i32
  }
}

</mosaic_0001>

<bundles_post_ra>
// kernel: mlp_forward.1
= control target key start
LH: loop header
LB: loop body
LE: loop exit
PB: predicated region body
PF: predicated region fallthrough
CT: control target
= control target key end

     0   :  { %s1666_s18 = smov 0   ;;  %s2032_s0 = inlined_call_operand.vmem [shape: f32[512,128], index: 0, kind: input, shape index: {}]   ;;  %s2033_s1 = inlined_call_operand.vmem [shape: bf16[128,512], index: 1, kind: input, shape index: {}]   ;;  %s2034_s2 = inlined_call_operand.vmem [shape: f32[1,512], index: 2, kind: input, shape index: {}]   ;;  %s2035_s3 = inlined_call_operand.vmem [shape: bf16[512,128], index: 3, kind: input, shape index: {}]   ;;  %s2036_s4 = inlined_call_operand.vmem [shape: f32[1,128], index: 4, kind: input, shape index: {}]   ;;  %s2037_s5 = inlined_call_operand.vmem [shape: f32[512,128], index: 5, kind: output, shape index: {}]  }
   0x1 LB: > { %s1334_s19 = sadd.s32 4294967295, %s1633_s18   ;;  %p1338_p0 = scmp.ge.s32.totalorder %s1633_s18, 1  ;;  %s1633_s18 = sphi %s1666_s18, %s15_s18  }
   0x2   : > { %p188_p1 = scmp.lt.s32.totalorder %s1633_s18, 5 }
   0x4   : > { %p189_p2 = pnand %p1338_p0, %p188_p1 }
   0x5   : > { %v1547_v0 = vld [vmem:[%s2033_s1 + $0x4] ss:$16 sps:$4 sm:$0xff] (!%p189_p2)   ;;  %v1549_v1 = vld [vmem:[%s2033_s1 + $0xc] ss:$16 sps:$4 sm:$0xff] (!%p189_p2)   ;;  %v1635_v2 = vmov (!%p189_p2), 0   ;;  %s1339_s25 = sshll.u32 (!%p189_p2), %s1334_s19, 4 }
   0x6   : > { %192 = sbr.rel (%p189_p2) target bundleno = 541 (0x21d), region = 40  ;;  %499 = vmatprep.mubr.bf16.mxu0 (!%p189_p2), %v1635_v2  ;;  %612 = vmatprep.mubr.bf16.mxu1 (!%p189_p2), %v1635_v2  ;;  %v1551_v3 = vld [vmem:[%s2033_s1] ss:$16 sps:$4 sm:$0xff] (!%p189_p2)   ;;  %v1552_v4 = vld [vmem:[%s2033_s1 + $0x8] ss:$16 sps:$4 sm:$0xff] (!%p189_p2)   ;;  %p217_p3 = scmp.lt.s32.totalorder (!%p189_p2), %s1339_s25, 63 }
   0x7   : > { %467 = vmatprep.subr.bf16.mxu0 (!%p189_p2), %v1547_v0  ;;  %580 = vmatprep.subr.bf16.mxu1 (!%p189_p2), %v1549_v1  ;;  %v1553_v5 = vld [vmem:[%s2033_s1 + $0x24] ss:$16 sps:$4 sm:$0xff] (!%p189_p2)   ;;  %v1555_v6 = vld [vmem:[%s2033_s1 + $0x2c] ss:$16 sps:$4 sm:$0xff] (!%p189_p2)   ;;  %v1557_v7 = vld [vmem:[%s2033_s1 + $0x20] ss:$16 sps:$4 sm:$0xff] (!%p189_p2)  }
   0x8   : > { %468 = vmatpush1.bf16.msra.mxu0 (!%p189_p2), %v1551_v3  ;;  %581 = vmatpush1.bf16.msra.mxu1 (!%p189_p2), %v1552_v4  ;;  %v1558_v8 = vld [vmem:[%s2033_s1 + $0x28] ss:$16 sps:$4 sm:$0xff] (!%p189_p2)   ;;  %v1559_v9 = vld [vmem:[%s2033_s1 + $0x44] ss:$16 sps:$4 sm:$0xff] (!%p189_p2)   ;;  %v1561_v10 = vld [vmem:[%s2033_s1 + $0x4c] ss:$16 sps:$4 sm:$0xff] (!%p189_p2)  }
   0x9   : > { %469 = vmatprep.subr.bf16.mxu0 (!%p189_p2), %v1553_v5  ;;  %582 = vmatprep.subr.bf16.mxu1 (!%p189_p2), %v1555_v6  ;;  %v1563_v11 = vld [vmem:[%s2033_s1 + $0x40] ss:$16 sps:$4 sm:$0xff] (!%p189_p2)   ;;  %v1564_v12 = vld [vmem:[%s2033_s1 + $0x48] ss:$16 sps:$4 sm:$0xff] (!%p189_p2)   ;;  %v1565_v13 = vld [vmem:[%s2033_s1 + $0x64] ss:$16 sps:$4 sm:$0xff] (!%p189_p2)  }
   0xa   : > { %v1567_v14 = vld [vmem:[%s2033_s1 + $0x6c] ss:$16 sps:$4 sm:$0xff] (!%p189_p2)   ;;  %v1569_v15 = vld [vmem:[%s2033_s1 + $0x60] ss:$16 sps:$4 sm:$0xff] (!%p189_p2)   ;;  %v1570_v16 = vld [vmem:[%s2033_s1 + $0x68] ss:$16 sps:$4 sm:$0xff] (!%p189_p2)  }
   0xb   : > { %v1571_v17 = vld [vmem:[%s2033_s1 + $0x84] ss:$16 sps:$4 sm:$0xff] (!%p189_p2)   ;;  %v1573_v18 = vld [vmem:[%s2033_s1 + $0x8c] ss:$16 sps:$4 sm:$0xff] (!%p189_p2)   ;;  %v1575_v19 = vld [vmem:[%s2033_s1 + $0x80] ss:$16 sps:$4 sm:$0xff] (!%p189_p2)  }
   0xc   : > { %470 = vmatpush1.bf16.msra.mxu0 (!%p189_p2), %v1557_v7  ;;  %583 = vmatpush1.bf16.msra.mxu1 (!%p189_p2), %v1558_v8  ;;  %v1576_v20 = vld [vmem:[%s2033_s1 + $0x88] ss:$16 sps:$4 sm:$0xff] (!%p189_p2)   ;;  %v1577_v21 = vld [vmem:[%s2033_s1 + $0xa4] ss:$16 sps:$4 sm:$0xff] (!%p189_p2)   ;;  %v1579_v22 = vld [vmem:[%s2033_s1 + $0xac] ss:$16 sps:$4 sm:$0xff] (!%p189_p2)  }
   0xd   : > { %471 = vmatprep.subr.bf16.mxu0 %v1559_v9  ;;  %584 = vmatprep.subr.bf16.mxu1 %v1561_v10  ;;  %s2039_s25 = smov (!%p217_p3, %s1339_s25), 63  ;;  %v1581_v23 = vld [vmem:[%s2033_s1 + $0xa0] ss:$16 sps:$4 sm:$0xff]   ;;  %v1582_v24 = vld [vmem:[%s2033_s1 + $0xa8] ss:$16 sps:$4 sm:$0xff]  }
   0xe   : > { %s1340_s22 = sshll.u32 %s2039_s25, 3  ;;  %v1583_v25 = vld [vmem:[%s2033_s1 + $0xc4] ss:$16 sps:$4 sm:$0xff]   ;;  %v1585_v26 = vld [vmem:[%s2033_s1 + $0xcc] ss:$16 sps:$4 sm:$0xff]  }
   0xf   : > { %s1764_s30 = scalar_lea.vmem %s2032_s0, %s1340_s22  ;;  %v1587_v27 = vld [vmem:[%s2033_s1 + $0xc0] ss:$16 sps:$4 sm:$0xff]   ;;  %v1588_v28 = vld [vmem:[%s2033_s1 + $0xc8] ss:$16 sps:$4 sm:$0xff]   ;;  %v1589_v29 = vld [vmem:[%s2033_s1 + $0xe4] ss:$16 sps:$4 sm:$0xff]   ;;  %s1997_s27 = scalar_lea.vmem %s2037_s5, %s1340_s22 }
  0x10   : > { %472 = vmatpush1.bf16.msra.mxu0 %v1563_v11  ;;  %585 = vmatpush1.bf16.msra.mxu1 %v1564_v12  ;;  %v1591_v30 = vld [vmem:[%s2033_s1 + $0xec] ss:$16 sps:$4 sm:$0xff]   ;;  %v1593_v31 = vld [vmem:[%s2033_s1 + $0xe0] ss:$16 sps:$4 sm:$0xff]   ;;  %v1594_v32 = vld [vmem:[%s2033_s1 + $0xe8] ss:$16 sps:$4 sm:$0xff]  }
  0x11   : > { %473 = vmatprep.subr.bf16.mxu0 %v1565_v13  ;;  %586 = vmatprep.subr.bf16.mxu1 %v1567_v14  ;;  %v229_v33 = vld [vmem:[%s1764_s30] sm:$0xff]  ;;  %v230_v34 = vld [vmem:[%s1764_s30 + $0x8] sm:$0xff]  ;;  %v231_v41 = vld [vmem:[%s1764_s30 + $0x10] sm:$0xff] }
  0x12   : > { %v1595_v35 = vld [vmem:[%s2035_s3 + $0x40] sm:$0xff]   ;;  %v245_v37 = vpack.c.bf16 %v230_v34, %v229_v33  ;;  %v1599_v40 = vld [vmem:[%s2035_s3 + $0x48] sm:$0xff]   ;;  %v232_v42 = vld [vmem:[%s1764_s30 + $0x18] sm:$0xff] }
  0x13   : > { %v1597_v36 = vld [vmem:[%s2035_s3 + $0xc0] sm:$0xff]   ;;  %v1601_v43 = vld [vmem:[%s2035_s3 + $0xc8] sm:$0xff]   ;;  %v1603_v46 = vld [vmem:[%s2035_s3 + $0x50] sm:$0xff]   ;;  %v246_v48 = vpack.c.bf16 %v232_v42, %v231_v41 }
  0x14   : > { %474 = vmatpush1.bf16.msra.mxu0 %v1569_v15  ;;  %587 = vmatpush1.bf16.msra.mxu1 %v1570_v16  ;;  %v1596_v38 = vld [vmem:[%s2035_s3] sm:$0xff]   ;;  %v1600_v44 = vld [vmem:[%s2035_s3 + $0x8] sm:$0xff]   ;;  %v1605_v47 = vld [vmem:[%s2035_s3 + $0xd0] sm:$0xff]  }
  0x15   : > { %475 = vmatprep.subr.bf16.mxu0 %v1571_v17  ;;  %588 = vmatprep.subr.bf16.mxu1 %v1573_v18  ;;  %v1598_v39 = vld [vmem:[%s2035_s3 + $0x80] sm:$0xff]   ;;  %v1602_v45 = vld [vmem:[%s2035_s3 + $0x88] sm:$0xff]   ;;  %v1604_v49 = vld [vmem:[%s2035_s3 + $0x10] sm:$0xff]  }
  0x16   : > { %v1606_v50 = vld [vmem:[%s2035_s3 + $0x90] sm:$0xff]   ;;  %v1607_v51 = vld [vmem:[%s2035_s3 + $0x58] sm:$0xff]   ;;  %v233_v52 = vld [vmem:[%s1764_s30 + $0x20] sm:$0xff] }
  0x17   : > { %v234_v53 = vld [vmem:[%s1764_s30 + $0x28] sm:$0xff]  ;;  %v1609_v54 = vld [vmem:[%s2035_s3 + $0xd8] sm:$0xff]   ;;  %v1611_v57 = vld [vmem:[%s2035_s3 + $0x60] sm:$0xff]  }
  0x18   : > { %476 = vmatpush1.bf16.msra.mxu0 %v1575_v19  ;;  %589 = vmatpush1.bf16.msra.mxu1 %v1576_v20  ;;  %v1608_v55 = vld [vmem:[%s2035_s3 + $0x18] sm:$0xff]   ;;  %v1613_v58 = vld [vmem:[%s2035_s3 + $0xe0] sm:$0xff]   ;;  %v247_v59 = vpack.c.bf16 %v234_v53, %v233_v52  ;;  %v1615_v62 = vld [vmem:[%s2035_s3 + $0x68] sm:$0xff]  }
  0x19   : > { %477 = vmatprep.subr.bf16.mxu0 %v1577_v21  ;;  %590 = vmatprep.subr.bf16.mxu1 %v1579_v22  ;;  %v1610_v56 = vld [vmem:[%s2035_s3 + $0x98] sm:$0xff]   ;;  %v1612_v60 = vld [vmem:[%s2035_s3 + $0x20] sm:$0xff]   ;;  %v235_v63 = vld [vmem:[%s1764_s30 + $0x30] sm:$0xff] }
  0x1a   : > { %v1614_v61 = vld [vmem:[%s2035_s3 + $0xa0] sm:$0xff]   ;;  %v1617_v0 = vld [vmem:[%s2035_s3 + $0xe8] sm:$0xff]   ;;  %v236_v1 = vld [vmem:[%s1764_s30 + $0x38] sm:$0xff] }
  0x1b   : > { %v1616_v3 = vld [vmem:[%s2035_s3 + $0x28] sm:$0xff]   ;;  %v1619_v5 = vld [vmem:[%s2035_s3 + $0x70] sm:$0xff]   ;;  %v248_v7 = vpack.c.bf16 %v236_v1, %v235_v63  ;;  %v237_v10 = vld [vmem:[%s1764_s30 + $0x40] sm:$0xff] }
  0x1c   : > { %478 = vmatpush1.bf16.msra.mxu0 %v1581_v23  ;;  %591 = vmatpush1.bf16.msra.mxu1 %v1582_v24  ;;  %v1618_v4 = vld [vmem:[%s2035_s3 + $0xa8] sm:$0xff]   ;;  %v1621_v6 = vld [vmem:[%s2035_s3 + $0xf0] sm:$0xff]   ;;  %v240_v14 = vld [vmem:[%s1764_s30 + $0x58] sm:$0xff] }
  0x1d   : > { %479 = vmatprep.subr.bf16.mxu0 %v1583_v25  ;;  %592 = vmatprep.subr.bf16.mxu1 %v1585_v26  ;;  %v1620_v8 = vld [vmem:[%s2035_s3 + $0x30] sm:$0xff]   ;;  %v238_v11 = vld [vmem:[%s1764_s30 + $0x48] sm:$0xff]  ;;  %v241_v16 = vld [vmem:[%s1764_s30 + $0x60] sm:$0xff]  ;;  %v287_v25 = vlaneseq }
  0x1e   : > { %v1622_v9 = vld [vmem:[%s2035_s3 + $0xb0] sm:$0xff]   ;;  %v249_v12 = vpack.c.bf16 %v238_v11, %v237_v10  ;;  %v242_v17 = vld [vmem:[%s1764_s30 + $0x68] sm:$0xff]  ;;  %v244_v20 = vld [vmem:[%s1764_s30 + $0x78] sm:$0xff] }
  0x1f   : > { %v239_v13 = vld [vmem:[%s1764_s30 + $0x50] sm:$0xff]  ;;  %v251_v18 = vpack.c.bf16 %v242_v17, %v241_v16  ;;  %v1623_v22 = vld [vmem:[%s2035_s3 + $0x78] sm:$0xff]   ;;  %v288_v26 = vshrl.u32 %v287_v25, 7 }
  0x20   : > { %480 = vmatpush1.bf16.msra.mxu0 %v1587_v27  ;;  %593 = vmatpush1.bf16.msra.mxu1 %v1588_v28  ;;  %v250_v15 = vpack.c.bf16 %v240_v14, %v239_v13  ;;  %v243_v19 = vld [vmem:[%s1764_s30 + $0x70] sm:$0xff]  ;;  %v1625_v23 = vld [vmem:[%s2035_s3 + $0xf8] sm:$0xff]  }
  0x21   : > { %481 = vmatprep.subr.bf16.mxu0 %v1589_v29  ;;  %594 = vmatprep.subr.bf16.mxu1 %v1591_v30  ;;  %v252_v21 = vpack.c.bf16 %v244_v20, %v243_v19  ;;  %v1624_v24 = vld [vmem:[%s2035_s3 + $0x38] sm:$0xff]   ;;  %v289_v27 = vsub.s32 0, %v288_v26  ;;  %v297_v28 = vsub.s32 2, %v288_v26  ;;  %v285_v29 = vld [vmem:[%s2034_s2] sm:$0xf]  ;;  %v293_v30 = vsub.s32 1, %v288_v26 }
  0x23   : > { %v1915_v33 = vrot.slane %v285_v29, %v297_v28  ;;  %v1917_v34 = vrot.slane %v285_v29, %v293_v30 }
  0x24   : > { %482 = vmatpush1.bf16.msra.mxu0 %v1593_v31  ;;  %595 = vmatpush1.bf16.msra.mxu1 %v1594_v32  ;;  %v301_v31 = vsub.s32 3, %v288_v26  ;;  %v1913_v32 = vrot.slane %v285_v29, %v289_v27 }
  0x25   : > { %1410 = vmatprep.subr.bf16.mxu0 %v1595_v35  ;;  %1474 = vmatprep.subr.bf16.mxu1 %v1597_v36 }
  0x26   : > { %v1919_v35 = vrot.slane %v285_v29, %v301_v31 }
  0x27   : > { %500 = vmatmul.mubr.bf16.vlgmr.msra.gmra.mrb[0].mxu0 %v245_v37  ;;  %613 = vmatmul.mubr.bf16.vlgmr.msra.gmra.mrb[0].mxu1 %v245_v37 }
  0x28   : > { %509 = vmatprep.mubr.bf16.mxu0 %v1635_v2  ;;  %622 = vmatprep.mubr.bf16.mxu1 %v1635_v2 }
  0x29   : > { %1411 = vmatpush3.bf16.msra.mxu0 %v1596_v38  ;;  %1475 = vmatpush3.bf16.msra.mxu1 %v1598_v39 }
  0x2a   : > { %1412 = vmatprep.subr.bf16.mxu0 %v1599_v40  ;;  %1476 = vmatprep.subr.bf16.mxu1 %v1601_v43 }
  0x2d   : > { %1413 = vmatpush3.bf16.msra.mxu0 %v1600_v44  ;;  %1477 = vmatpush3.bf16.msra.mxu1 %v1602_v45 }
  0x2e   : > { %1414 = vmatprep.subr.bf16.mxu0 %v1603_v46  ;;  %1478 = vmatprep.subr.bf16.mxu1 %v1605_v47 }
  0x2f   : > { %510 = vmatmul.mubr.bf16.gmra.mrb[4].mxu0 %v246_v48  ;;  %623 = vmatmul.mubr.bf16.gmra.mrb[4].mxu1 %v246_v48 }
  0x30   : > { %519 = vmatprep.mubr.bf16.mxu0 %v1635_v2  ;;  %632 = vmatprep.mubr.bf16.mxu1 %v1635_v2 }
  0x31   : > { %1415 = vmatpush3.bf16.msra.mxu0 %v1604_v49  ;;  %1479 = vmatpush3.bf16.msra.mxu1 %v1606_v50 }
  0x32   : > { %1416 = vmatprep.subr.bf16.mxu0 %v1607_v51  ;;  %1480 = vmatprep.subr.bf16.mxu1 %v1609_v54 }
  0x35   : > { %1417 = vmatpush3.bf16.msra.mxu0 %v1608_v55  ;;  %1481 = vmatpush3.bf16.msra.mxu1 %v1610_v56 }
  0x36   : > { %1418 = vmatprep.subr.bf16.mxu0 %v1611_v57  ;;  %1482 = vmatprep.subr.bf16.mxu1 %v1613_v58 }
  0x37   : > { %520 = vmatmul.mubr.bf16.gmra.mrb[8].mxu0 %v247_v59  ;;  %633 = vmatmul.mubr.bf16.gmra.mrb[8].mxu1 %v247_v59 }
  0x38   : > { %529 = vmatprep.mubr.bf16.mxu0 %v1635_v2  ;;  %642 = vmatprep.mubr.bf16.mxu1 %v1635_v2 }
  0x39   : > { %1419 = vmatpush3.bf16.msra.mxu0 %v1612_v60  ;;  %1483 = vmatpush3.bf16.msra.mxu1 %v1614_v61 }
  0x3a   : > { %1420 = vmatprep.subr.bf16.mxu0 %v1615_v62  ;;  %1484 = vmatprep.subr.bf16.mxu1 %v1617_v0 }
  0x3d   : > { %1421 = vmatpush3.bf16.msra.mxu0 %v1616_v3  ;;  %1485 = vmatpush3.bf16.msra.mxu1 %v1618_v4 }
  0x3e   : > { %1422 = vmatprep.subr.bf16.mxu0 %v1619_v5  ;;  %1486 = vmatprep.subr.bf16.mxu1 %v1621_v6 }
  0x3f   : > { %530 = vmatmul.mubr.bf16.gmra.mrb[12].mxu0 %v248_v7  ;;  %643 = vmatmul.mubr.bf16.gmra.mrb[12].mxu1 %v248_v7 }
  0x40   : > { %539 = vmatprep.mubr.bf16.mxu0 %v1635_v2  ;;  %652 = vmatprep.mubr.bf16.mxu1 %v1635_v2 }
  0x41   : > { %1423 = vmatpush3.bf16.msra.mxu0 %v1620_v8  ;;  %1487 = vmatpush3.bf16.msra.mxu1 %v1622_v9 }
  0x42   : > { %1424 = vmatprep.subr.bf16.mxu0 %v1623_v22  ;;  %1488 = vmatprep.subr.bf16.mxu1 %v1625_v23 }
  0x45   : > { %1425 = vmatpush3.bf16.msra.mxu0 %v1624_v24 }
  0x47   : > { %540 = vmatmul.mubr.bf16.gmra.mrb[16].mxu0 %v249_v12  ;;  %653 = vmatmul.mubr.bf16.gmra.mrb[16].mxu1 %v249_v12 }
  0x48   : > { %549 = vmatprep.mubr.bf16.mxu0 %v1635_v2  ;;  %662 = vmatprep.mubr.bf16.mxu1 %v1635_v2 }
  0x4f   : > { %550 = vmatmul.mubr.bf16.gmra.mrb[20].mxu0 %v250_v15  ;;  %663 = vmatmul.mubr.bf16.gmra.mrb[20].mxu1 %v250_v15 }
  0x50   : > { %559 = vmatprep.mubr.bf16.mxu0 %v1635_v2  ;;  %672 = vmatprep.mubr.bf16.mxu1 %v1635_v2 }
  0x57   : > { %560 = vmatmul.mubr.bf16.gmra.mrb[24].mxu0 %v251_v18  ;;  %673 = vmatmul.mubr.bf16.gmra.mrb[24].mxu1 %v251_v18 }
  0x58   : > { %569 = vmatprep.mubr.bf16.mxu0 %v1635_v2  ;;  %682 = vmatprep.mubr.bf16.mxu1 %v1635_v2  ;;  %v1626_v2 = vld [vmem:[%s2035_s3 + $0xb8] sm:$0xff]  }
  0x59   : > { %1489 = vmatpush3.bf16.msra.mxu1 %v1626_v2 }
  0x5f   : > { %570 = vmatmul.mubr.bf16.gmra.mrb[28].mxu0 %v252_v21  ;;  %683 = vmatmul.mubr.bf16.gmra.mrb[28].mxu1 %v252_v21 }
  0xfa   : > { %v501_v36 = vpop.f32.mrb[0].mxu0  ;;  %v614_v37 = vpop.f32.mrb[0].mxu1 }
  0xfb   : > { %v502_v38 = vadd.f32 %v501_v36, %v1913_v32  ;;  %v615_v39 = vadd.f32 %v614_v37, %v1915_v33  ;;  %v503_v40 = vpop.f32.mrb[1].mxu0  ;;  %v616_v41 = vpop.f32.mrb[1].mxu1 }
  0xfc   : > { %v504_v42 = vadd.f32 %v503_v40, %v1917_v34  ;;  %v617_v43 = vadd.f32 %v616_v41, %v1919_v35  ;;  %v505_v44 = vpop.f32.mrb[2].mxu0  ;;  %v618_v45 = vpop.f32.mrb[2].mxu1 }
  0xfd   : > { %v695_v46 = vmax.f32 %v615_v39, 0.0  ;;  %v506_v47 = vadd.f32 %v505_v44, %v1913_v32  ;;  %v619_v48 = vadd.f32 %v618_v45, %v1915_v33  ;;  %v507_v49 = vpop.f32.mrb[3].mxu0  ;;  %v620_v50 = vpop.f32.mrb[3].mxu1  ;;  %v693_v54 = vmax.f32 %v502_v38, 0.0 }
  0xfe   : > { %v696_v51 = vmax.f32 %v617_v43, 0.0  ;;  %v508_v52 = vadd.f32 %v507_v49, %v1917_v34  ;;  %v621_v53 = vadd.f32 %v620_v50, %v1919_v35  ;;  %v694_v57 = vmax.f32 %v504_v42, 0.0 }
  0xff   : > { %v697_v55 = vmax.f32 %v506_v47, 0.0  ;;  %v699_v56 = vmax.f32 %v619_v48, 0.0 }
 0x100   : > { %v698_v58 = vmax.f32 %v508_v52, 0.0  ;;  %v700_v59 = vmax.f32 %v621_v53, 0.0 }
 0x101   : > { %v757_v60 = vpack.c.bf16 %v697_v55, %v693_v54  ;;  %v759_v61 = vpack.c.bf16 %v699_v56, %v695_v46 }
 0x102   : > { %v758_v62 = vpack.c.bf16 %v698_v58, %v694_v57  ;;  %v760_v63 = vpack.c.bf16 %v700_v59, %v696_v51  ;;  %v511_v0 = vpop.f32.mrb[4].mxu0  ;;  %v624_v1 = vpop.f32.mrb[4].mxu1 }
 0x103   : > { %v512_v3 = vadd.f32 %v511_v0, %v1913_v32  ;;  %v625_v4 = vadd.f32 %v624_v1, %v1915_v33  ;;  %v513_v5 = vpop.f32.mrb[5].mxu0  ;;  %v626_v6 = vpop.f32.mrb[5].mxu1 }
 0x104   : > { %v514_v7 = vadd.f32 %v513_v5, %v1917_v34  ;;  %v627_v8 = vadd.f32 %v626_v6, %v1919_v35  ;;  %v515_v9 = vpop.f32.mrb[6].mxu0  ;;  %v628_v10 = vpop.f32.mrb[6].mxu1  ;;  %1084 = vmatprep.mubr.bf16.mxu0 %v758_v62  ;;  %1181 = vmatprep.mubr.bf16.mxu1 %v760_v63 }
 0x105   : > { %v703_v11 = vmax.f32 %v625_v4, 0.0  ;;  %v516_v12 = vadd.f32 %v515_v9, %v1913_v32  ;;  %v629_v13 = vadd.f32 %v628_v10, %v1915_v33  ;;  %v517_v14 = vpop.f32.mrb[7].mxu0  ;;  %v630_v15 = vpop.f32.mrb[7].mxu1  ;;  %1085 = vmatmul.mubr.bf16.vlgmr.msra.gmra.mrb[32].mxu0 %v757_v60  ;;  %1182 = vmatmul.mubr.bf16.vlgmr.msra.gmra.mrb[32].mxu1 %v759_v61  ;;  %v701_v19 = vmax.f32 %v512_v3, 0.0 }
 0x106   : > { %v704_v16 = vmax.f32 %v627_v8, 0.0  ;;  %v518_v17 = vadd.f32 %v517_v14, %v1917_v34  ;;  %v631_v18 = vadd.f32 %v630_v15, %v1919_v35  ;;  %v702_v22 = vmax.f32 %v514_v7, 0.0 }
 0x107   : > { %v705_v20 = vmax.f32 %v516_v12, 0.0  ;;  %v707_v21 = vmax.f32 %v629_v13, 0.0 }
 0x108   : > { %v706_v23 = vmax.f32 %v518_v17, 0.0  ;;  %v708_v24 = vmax.f32 %v631_v18, 0.0 }
 0x109   : > { %v761_v2 = vpack.c.bf16 %v705_v20, %v701_v19  ;;  %v763_v25 = vpack.c.bf16 %v707_v21, %v703_v11 }
 0x10a   : > { %v762_v26 = vpack.c.bf16 %v706_v23, %v702_v22  ;;  %v764_v27 = vpack.c.bf16 %v708_v24, %v704_v16  ;;  %v521_v28 = vpop.f32.mrb[8].mxu0  ;;  %v634_v29 = vpop.f32.mrb[8].mxu1 }
 0x10b   : > { %v522_v30 = vadd.f32 %v521_v28, %v1913_v32  ;;  %v635_v31 = vadd.f32 %v634_v29, %v1915_v33  ;;  %v523_v36 = vpop.f32.mrb[9].mxu0  ;;  %v636_v37 = vpop.f32.mrb[9].mxu1 }
 0x10c   : > { %v524_v38 = vadd.f32 %v523_v36, %v1917_v34  ;;  %v637_v39 = vadd.f32 %v636_v37, %v1919_v35  ;;  %v525_v40 = vpop.f32.mrb[10].mxu0  ;;  %v638_v41 = vpop.f32.mrb[10].mxu1  ;;  %1092 = vmatprep.mubr.bf16.mxu0 %v762_v26  ;;  %1189 = vmatprep.mubr.bf16.mxu1 %v764_v27 }
 0x10d   : > { %v711_v42 = vmax.f32 %v635_v31, 0.0  ;;  %v526_v43 = vadd.f32 %v525_v40, %v1913_v32  ;;  %v639_v44 = vadd.f32 %v638_v41, %v1915_v33  ;;  %v527_v45 = vpop.f32.mrb[11].mxu0  ;;  %v640_v46 = vpop.f32.mrb[11].mxu1  ;;  %1093 = vmatmul.mubr.bf16.gmra.mrb[36].mxu0 %v761_v2  ;;  %1190 = vmatmul.mubr.bf16.gmra.mrb[36].mxu1 %v763_v25  ;;  %v709_v50 = vmax.f32 %v522_v30, 0.0 }
 0x10e   : > { %v712_v47 = vmax.f32 %v637_v39, 0.0  ;;  %v528_v48 = vadd.f32 %v527_v45, %v1917_v34  ;;  %v641_v49 = vadd.f32 %v640_v46, %v1919_v35  ;;  %v710_v53 = vmax.f32 %v524_v38, 0.0 }
 0x10f   : > { %v713_v51 = vmax.f32 %v526_v43, 0.0  ;;  %v715_v52 = vmax.f32 %v639_v44, 0.0 }
 0x110   : > { %v714_v54 = vmax.f32 %v528_v48, 0.0  ;;  %v716_v55 = vmax.f32 %v641_v49, 0.0 }
 0x111   : > { %v765_v56 = vpack.c.bf16 %v713_v51, %v709_v50  ;;  %v767_v57 = vpack.c.bf16 %v715_v52, %v711_v42 }
 0x112   : > { %v766_v58 = vpack.c.bf16 %v714_v54, %v710_v53  ;;  %v768_v59 = vpack.c.bf16 %v716_v55, %v712_v47  ;;  %v531_v60 = vpop.f32.mrb[12].mxu0  ;;  %v644_v61 = vpop.f32.mrb[12].mxu1 }
 0x113   : > { %v532_v62 = vadd.f32 %v531_v60, %v1913_v32  ;;  %v645_v63 = vadd.f32 %v644_v61, %v1915_v33  ;;  %v533_v0 = vpop.f32.mrb[13].mxu0  ;;  %v646_v1 = vpop.f32.mrb[13].mxu1 }
 0x114   : > { %v534_v3 = vadd.f32 %v533_v0, %v1917_v34  ;;  %v647_v4 = vadd.f32 %v646_v1, %v1919_v35  ;;  %v535_v5 = vpop.f32.mrb[14].mxu0  ;;  %v648_v6 = vpop.f32.mrb[14].mxu1  ;;  %1100 = vmatprep.mubr.bf16.mxu0 %v766_v58  ;;  %1197 = vmatprep.mubr.bf16.mxu1 %v768_v59 }
 0x115   : > { %v719_v7 = vmax.f32 %v645_v63, 0.0  ;;  %v536_v8 = vadd.f32 %v535_v5, %v1913_v32  ;;  %v649_v9 = vadd.f32 %v648_v6, %v1915_v33  ;;  %v537_v10 = vpop.f32.mrb[15].mxu0  ;;  %v650_v11 = vpop.f32.mrb[15].mxu1  ;;  %1101 = vmatmul.mubr.bf16.gmra.mrb[40].mxu0 %v765_v56  ;;  %1198 = vmatmul.mubr.bf16.gmra.mrb[40].mxu1 %v767_v57  ;;  %v717_v15 = vmax.f32 %v532_v62, 0.0 }
 0x116   : > { %v720_v12 = vmax.f32 %v647_v4, 0.0  ;;  %v538_v13 = vadd.f32 %v537_v10, %v1917_v34  ;;  %v651_v14 = vadd.f32 %v650_v11, %v1919_v35  ;;  %v718_v18 = vmax.f32 %v534_v3, 0.0 }
 0x117   : > { %v721_v16 = vmax.f32 %v536_v8, 0.0  ;;  %v723_v17 = vmax.f32 %v649_v9, 0.0 }
 0x118   : > { %v722_v19 = vmax.f32 %v538_v13, 0.0  ;;  %v724_v20 = vmax.f32 %v651_v14, 0.0 }
 0x119   : > { %v769_v21 = vpack.c.bf16 %v721_v16, %v717_v15  ;;  %v771_v22 = vpack.c.bf16 %v723_v17, %v719_v7 }
 0x11a   : > { %v770_v23 = vpack.c.bf16 %v722_v19, %v718_v18  ;;  %v772_v24 = vpack.c.bf16 %v724_v20, %v720_v12  ;;  %v541_v2 = vpop.f32.mrb[16].mxu0  ;;  %v654_v25 = vpop.f32.mrb[16].mxu1 }
 0x11b   : > { %v542_v26 = vadd.f32 %v541_v2, %v1913_v32  ;;  %v655_v27 = vadd.f32 %v654_v25, %v1915_v33  ;;  %v543_v28 = vpop.f32.mrb[17].mxu0  ;;  %v656_v29 = vpop.f32.mrb[17].mxu1 }
 0x11c   : > { %v544_v30 = vadd.f32 %v543_v28, %v1917_v34  ;;  %v657_v31 = vadd.f32 %v656_v29, %v1919_v35  ;;  %v545_v36 = vpop.f32.mrb[18].mxu0  ;;  %v658_v37 = vpop.f32.mrb[18].mxu1  ;;  %1108 = vmatprep.mubr.bf16.mxu0 %v770_v23  ;;  %1205 = vmatprep.mubr.bf16.mxu1 %v772_v24 }
 0x11d   : > { %v727_v38 = vmax.f32 %v655_v27, 0.0  ;;  %v546_v39 = vadd.f32 %v545_v36, %v1913_v32  ;;  %v659_v40 = vadd.f32 %v658_v37, %v1915_v33  ;;  %v547_v41 = vpop.f32.mrb[19].mxu0  ;;  %v660_v42 = vpop.f32.mrb[19].mxu1  ;;  %1109 = vmatmul.mubr.bf16.gmra.mrb[44].mxu0 %v769_v21  ;;  %1206 = vmatmul.mubr.bf16.gmra.mrb[44].mxu1 %v771_v22  ;;  %v725_v46 = vmax.f32 %v542_v26, 0.0 }
 0x11e   : > { %v728_v43 = vmax.f32 %v657_v31, 0.0  ;;  %v548_v44 = vadd.f32 %v547_v41, %v1917_v34  ;;  %v661_v45 = vadd.f32 %v660_v42, %v1919_v35  ;;  %v726_v49 = vmax.f32 %v544_v30, 0.0 }
 0x11f   : > { %v729_v47 = vmax.f32 %v546_v39, 0.0  ;;  %v731_v48 = vmax.f32 %v659_v40, 0.0 }
 0x120   : > { %v730_v50 = vmax.f32 %v548_v44, 0.0  ;;  %v732_v51 = vmax.f32 %v661_v45, 0.0 }
 0x121   : > { %v773_v52 = vpack.c.bf16 %v729_v47, %v725_v46  ;;  %v775_v53 = vpack.c.bf16 %v731_v48, %v727_v38 }
 0x122   : > { %v774_v54 = vpack.c.bf16 %v730_v50, %v726_v49  ;;  %v776_v55 = vpack.c.bf16 %v732_v51, %v728_v43  ;;  %v551_v56 = vpop.f32.mrb[20].mxu0  ;;  %v664_v57 = vpop.f32.mrb[20].mxu1 }
 0x123   : > { %v552_v58 = vadd.f32 %v551_v56, %v1913_v32  ;;  %v665_v59 = vadd.f32 %v664_v57, %v1915_v33  ;;  %v553_v60 = vpop.f32.mrb[21].mxu0  ;;  %v666_v61 = vpop.f32.mrb[21].mxu1 }
 0x124   : > { %v554_v62 = vadd.f32 %v553_v60, %v1917_v34  ;;  %v667_v63 = vadd.f32 %v666_v61, %v1919_v35  ;;  %v555_v0 = vpop.f32.mrb[22].mxu0  ;;  %v668_v1 = vpop.f32.mrb[22].mxu1  ;;  %1116 = vmatprep.mubr.bf16.mxu0 %v774_v54  ;;  %1213 = vmatprep.mubr.bf16.mxu1 %v776_v55 }
 0x125   : > { %v735_v3 = vmax.f32 %v665_v59, 0.0  ;;  %v556_v4 = vadd.f32 %v555_v0, %v1913_v32  ;;  %v669_v5 = vadd.f32 %v668_v1, %v1915_v33  ;;  %v557_v6 = vpop.f32.mrb[23].mxu0  ;;  %v670_v7 = vpop.f32.mrb[23].mxu1  ;;  %1117 = vmatmul.mubr.bf16.gmra.mrb[48].mxu0 %v773_v52  ;;  %1214 = vmatmul.mubr.bf16.gmra.mrb[48].mxu1 %v775_v53  ;;  %v733_v11 = vmax.f32 %v552_v58, 0.0 }
 0x126   : > { %v736_v8 = vmax.f32 %v667_v63, 0.0  ;;  %v558_v9 = vadd.f32 %v557_v6, %v1917_v34  ;;  %v671_v10 = vadd.f32 %v670_v7, %v1919_v35  ;;  %v734_v14 = vmax.f32 %v554_v62, 0.0 }
 0x127   : > { %v737_v12 = vmax.f32 %v556_v4, 0.0  ;;  %v739_v13 = vmax.f32 %v669_v5, 0.0 }
 0x128   : > { %v738_v15 = vmax.f32 %v558_v9, 0.0  ;;  %v740_v16 = vmax.f32 %v671_v10, 0.0 }
 0x129   : > { %v777_v17 = vpack.c.bf16 %v737_v12, %v733_v11  ;;  %v779_v18 = vpack.c.bf16 %v739_v13, %v735_v3 }
 0x12a   : > { %v778_v19 = vpack.c.bf16 %v738_v15, %v734_v14  ;;  %v780_v20 = vpack.c.bf16 %v740_v16, %v736_v8  ;;  %v561_v21 = vpop.f32.mrb[24].mxu0  ;;  %v674_v22 = vpop.f32.mrb[24].mxu1 }
 0x12b   : > { %v562_v23 = vadd.f32 %v561_v21, %v1913_v32  ;;  %v675_v24 = vadd.f32 %v674_v22, %v1915_v33  ;;  %v563_v2 = vpop.f32.mrb[25].mxu0  ;;  %v676_v25 = vpop.f32.mrb[25].mxu1 }
 0x12c   : > { %v564_v26 = vadd.f32 %v563_v2, %v1917_v34  ;;  %v677_v27 = vadd.f32 %v676_v25, %v1919_v35  ;;  %v565_v28 = vpop.f32.mrb[26].mxu0  ;;  %v678_v29 = vpop.f32.mrb[26].mxu1  ;;  %1124 = vmatprep.mubr.bf16.mxu0 %v778_v19  ;;  %1221 = vmatprep.mubr.bf16.mxu1 %v780_v20 }
 0x12d   : > { %v743_v30 = vmax.f32 %v675_v24, 0.0  ;;  %v566_v31 = vadd.f32 %v565_v28, %v1913_v32  ;;  %v679_v36 = vadd.f32 %v678_v29, %v1915_v33  ;;  %v567_v37 = vpop.f32.mrb[27].mxu0  ;;  %v680_v38 = vpop.f32.mrb[27].mxu1  ;;  %1125 = vmatmul.mubr.bf16.gmra.mrb[52].mxu0 %v777_v17  ;;  %1222 = vmatmul.mubr.bf16.gmra.mrb[52].mxu1 %v779_v18  ;;  %v741_v42 = vmax.f32 %v562_v23, 0.0 }
 0x12e   : > { %v744_v39 = vmax.f32 %v677_v27, 0.0  ;;  %v568_v40 = vadd.f32 %v567_v37, %v1917_v34  ;;  %v681_v41 = vadd.f32 %v680_v38, %v1919_v35  ;;  %v742_v45 = vmax.f32 %v564_v26, 0.0 }
 0x12f   : > { %v745_v43 = vmax.f32 %v566_v31, 0.0  ;;  %v747_v44 = vmax.f32 %v679_v36, 0.0 }
 0x130   : > { %v746_v46 = vmax.f32 %v568_v40, 0.0  ;;  %v748_v47 = vmax.f32 %v681_v41, 0.0 }
 0x131   : > { %v781_v48 = vpack.c.bf16 %v745_v43, %v741_v42  ;;  %v783_v49 = vpack.c.bf16 %v747_v44, %v743_v30 }
 0x132   : > { %v782_v50 = vpack.c.bf16 %v746_v46, %v742_v45  ;;  %v784_v51 = vpack.c.bf16 %v748_v47, %v744_v39  ;;  %v571_v52 = vpop.f32.mrb[28].mxu0  ;;  %v684_v53 = vpop.f32.mrb[28].mxu1 }
 0x133   : > { %v572_v54 = vadd.f32 %v571_v52, %v1913_v32  ;;  %v685_v55 = vadd.f32 %v684_v53, %v1915_v33  ;;  %v573_v56 = vpop.f32.mrb[29].mxu0  ;;  %v686_v57 = vpop.f32.mrb[29].mxu1 }
 0x134   : > { %v574_v58 = vadd.f32 %v573_v56, %v1917_v34  ;;  %v687_v59 = vadd.f32 %v686_v57, %v1919_v35  ;;  %v575_v60 = vpop.f32.mrb[30].mxu0  ;;  %v688_v61 = vpop.f32.mrb[30].mxu1  ;;  %1132 = vmatprep.mubr.bf16.mxu0 %v782_v50  ;;  %1229 = vmatprep.mubr.bf16.mxu1 %v784_v51 }
 0x135   : > { %v751_v62 = vmax.f32 %v685_v55, 0.0  ;;  %v576_v63 = vadd.f32 %v575_v60, %v1913_v32  ;;  %v689_v0 = vadd.f32 %v688_v61, %v1915_v33  ;;  %v577_v1 = vpop.f32.mrb[31].mxu0  ;;  %v690_v3 = vpop.f32.mrb[31].mxu1  ;;  %1133 = vmatmul.mubr.bf16.gmra.mrb[56].mxu0 %v781_v48  ;;  %1230 = vmatmul.mubr.bf16.gmra.mrb[56].mxu1 %v783_v49  ;;  %v749_v7 = vmax.f32 %v572_v54, 0.0 }
 0x136   : > { %v752_v4 = vmax.f32 %v687_v59, 0.0  ;;  %v578_v5 = vadd.f32 %v577_v1, %v1917_v34  ;;  %v691_v6 = vadd.f32 %v690_v3, %v1919_v35  ;;  %v750_v10 = vmax.f32 %v574_v58, 0.0  ;;  %v1988_v34 = vld [vmem:[%s2036_s4] ss:$0 sm:$0xff] }
 0x137   : > { %v753_v8 = vmax.f32 %v576_v63, 0.0  ;;  %v755_v9 = vmax.f32 %v689_v0, 0.0 }
 0x138   : > { %v754_v11 = vmax.f32 %v578_v5, 0.0  ;;  %v756_v12 = vmax.f32 %v691_v6, 0.0 }
 0x139   : > { %v785_v13 = vpack.c.bf16 %v753_v8, %v749_v7  ;;  %v787_v14 = vpack.c.bf16 %v755_v9, %v751_v62 }
 0x13a   : > { %v786_v32 = vpack.c.bf16 %v754_v11, %v750_v10  ;;  %v788_v15 = vpack.c.bf16 %v756_v12, %v752_v4 }
 0x13c   : > { %1140 = vmatprep.mubr.bf16.mxu0 %v786_v32  ;;  %1237 = vmatprep.mubr.bf16.mxu1 %v788_v15 }
 0x13d   : > { %1141 = vmatmul.mubr.bf16.gmra.mrb[60].mxu0 %v785_v13  ;;  %1238 = vmatmul.mubr.bf16.gmra.mrb[60].mxu1 %v787_v14 }
 0x1d8   : > { %v1426_v33 = vpop.f32.mrb[32].mxu0  ;;  %v1490_v16 = vpop.f32.mrb[32].mxu1 }
 0x1d9   : > { %v1427_v35 = vpop.f32.mrb[33].mxu0  ;;  %v1491_v17 = vpop.f32.mrb[33].mxu1 }
 0x1da   : > { %v1428_v18 = vadd.f32 %v1427_v35, %v1426_v33  ;;  %v1492_v19 = vadd.f32 %v1491_v17, %v1490_v16  ;;  %v1429_v20 = vpop.f32.mrb[34].mxu0  ;;  %v1493_v21 = vpop.f32.mrb[34].mxu1 }
 0x1db   : > { %v1430_v22 = vpop.f32.mrb[35].mxu0  ;;  %v1494_v23 = vpop.f32.mrb[35].mxu1 }
 0x1dc   : > { %v1087_v24 = vadd.f32 %v1428_v18, %v1988_v34  ;;  %v1431_v2 = vadd.f32 %v1430_v22, %v1429_v20  ;;  %v1495_v25 = vadd.f32 %v1494_v23, %v1493_v21 }
 0x1de   : > { %v1184_v26 = vadd.f32 %v1492_v19, %v1087_v24  ;;  %v1090_v27 = vadd.f32 %v1431_v2, %v1988_v34 }
 0x1e0   : > { %v1246_v28 = vmax.f32 %v1184_v26, 0.0  ;;  %v1187_v29 = vadd.f32 %v1495_v25, %v1090_v27  ;;  %v1432_v30 = vpop.f32.mrb[36].mxu0  ;;  %v1496_v31 = vpop.f32.mrb[36].mxu1 }
 0x1e1   : > { %v1433_v36 = vpop.f32.mrb[37].mxu0  ;;  %v1497_v37 = vpop.f32.mrb[37].mxu1 }
 0x1e2   : > { %1262 = vst [vmem:[%s1997_s27] sm:$0xff] %v1246_v28  ;;  %v1247_v38 = vmax.f32 %v1187_v29, 0.0  ;;  %v1434_v39 = vadd.f32 %v1433_v36, %v1432_v30  ;;  %v1498_v40 = vadd.f32 %v1497_v37, %v1496_v31  ;;  %v1435_v41 = vpop.f32.mrb[38].mxu0  ;;  %v1499_v42 = vpop.f32.mrb[38].mxu1 }
 0x1e3   : > { %v1436_v43 = vpop.f32.mrb[39].mxu0  ;;  %v1500_v44 = vpop.f32.mrb[39].mxu1 }
 0x1e4   : > { %1263 = vst [vmem:[%s1997_s27 + $0x8] sm:$0xff] %v1247_v38  ;;  %v1095_v45 = vadd.f32 %v1434_v39, %v1988_v34  ;;  %v1437_v46 = vadd.f32 %v1436_v43, %v1435_v41  ;;  %v1501_v47 = vadd.f32 %v1500_v44, %v1499_v42 }
 0x1e6   : > { %v1192_v48 = vadd.f32 %v1498_v40, %v1095_v45  ;;  %v1098_v49 = vadd.f32 %v1437_v46, %v1988_v34 }
 0x1e8   : > { %v1248_v50 = vmax.f32 %v1192_v48, 0.0  ;;  %v1195_v51 = vadd.f32 %v1501_v47, %v1098_v49  ;;  %v1438_v52 = vpop.f32.mrb[40].mxu0  ;;  %v1502_v53 = vpop.f32.mrb[40].mxu1 }
 0x1e9   : > { %v1439_v54 = vpop.f32.mrb[41].mxu0  ;;  %v1503_v55 = vpop.f32.mrb[41].mxu1 }
 0x1ea   : > { %1264 = vst [vmem:[%s1997_s27 + $0x10] sm:$0xff] %v1248_v50  ;;  %v1249_v56 = vmax.f32 %v1195_v51, 0.0  ;;  %v1440_v57 = vadd.f32 %v1439_v54, %v1438_v52  ;;  %v1504_v58 = vadd.f32 %v1503_v55, %v1502_v53  ;;  %v1441_v59 = vpop.f32.mrb[42].mxu0  ;;  %v1505_v60 = vpop.f32.mrb[42].mxu1 }
 0x1eb   : > { %v1442_v61 = vpop.f32.mrb[43].mxu0  ;;  %v1506_v62 = vpop.f32.mrb[43].mxu1 }
 0x1ec   : > { %1265 = vst [vmem:[%s1997_s27 + $0x18] sm:$0xff] %v1249_v56  ;;  %v1103_v63 = vadd.f32 %v1440_v57, %v1988_v34  ;;  %v1443_v0 = vadd.f32 %v1442_v61, %v1441_v59  ;;  %v1507_v1 = vadd.f32 %v1506_v62, %v1505_v60 }
 0x1ee   : > { %v1200_v3 = vadd.f32 %v1504_v58, %v1103_v63  ;;  %v1106_v4 = vadd.f32 %v1443_v0, %v1988_v34 }
 0x1f0   : > { %v1250_v5 = vmax.f32 %v1200_v3, 0.0  ;;  %v1203_v6 = vadd.f32 %v1507_v1, %v1106_v4  ;;  %v1444_v7 = vpop.f32.mrb[44].mxu0  ;;  %v1508_v8 = vpop.f32.mrb[44].mxu1 }
 0x1f1   : > { %v1445_v9 = vpop.f32.mrb[45].mxu0  ;;  %v1509_v10 = vpop.f32.mrb[45].mxu1 }
 0x1f2   : > { %1266 = vst [vmem:[%s1997_s27 + $0x20] sm:$0xff] %v1250_v5  ;;  %v1251_v11 = vmax.f32 %v1203_v6, 0.0  ;;  %v1446_v12 = vadd.f32 %v1445_v9, %v1444_v7  ;;  %v1510_v13 = vadd.f32 %v1509_v10, %v1508_v8  ;;  %v1447_v14 = vpop.f32.mrb[46].mxu0  ;;  %v1511_v32 = vpop.f32.mrb[46].mxu1 }
 0x1f3   : > { %v1448_v15 = vpop.f32.mrb[47].mxu0  ;;  %v1512_v33 = vpop.f32.mrb[47].mxu1 }
 0x1f4   : > { %1267 = vst [vmem:[%s1997_s27 + $0x28] sm:$0xff] %v1251_v11  ;;  %v1111_v16 = vadd.f32 %v1446_v12, %v1988_v34  ;;  %v1449_v35 = vadd.f32 %v1448_v15, %v1447_v14  ;;  %v1513_v17 = vadd.f32 %v1512_v33, %v1511_v32 }
 0x1f6   : > { %v1208_v18 = vadd.f32 %v1510_v13, %v1111_v16  ;;  %v1114_v19 = vadd.f32 %v1449_v35, %v1988_v34 }
 0x1f8   : > { %v1252_v20 = vmax.f32 %v1208_v18, 0.0  ;;  %v1211_v21 = vadd.f32 %v1513_v17, %v1114_v19  ;;  %v1450_v22 = vpop.f32.mrb[48].mxu0  ;;  %v1514_v23 = vpop.f32.mrb[48].mxu1 }
 0x1f9   : > { %v1451_v24 = vpop.f32.mrb[49].mxu0  ;;  %v1515_v2 = vpop.f32.mrb[49].mxu1 }
 0x1fa   : > { %1268 = vst [vmem:[%s1997_s27 + $0x30] sm:$0xff] %v1252_v20  ;;  %v1253_v25 = vmax.f32 %v1211_v21, 0.0  ;;  %v1452_v26 = vadd.f32 %v1451_v24, %v1450_v22  ;;  %v1516_v27 = vadd.f32 %v1515_v2, %v1514_v23  ;;  %v1453_v28 = vpop.f32.mrb[50].mxu0  ;;  %v1517_v29 = vpop.f32.mrb[50].mxu1 }
 0x1fb   : > { %v1454_v30 = vpop.f32.mrb[51].mxu0  ;;  %v1518_v31 = vpop.f32.mrb[51].mxu1 }
 0x1fc   : > { %1269 = vst [vmem:[%s1997_s27 + $0x38] sm:$0xff] %v1253_v25  ;;  %v1119_v36 = vadd.f32 %v1452_v26, %v1988_v34  ;;  %v1455_v37 = vadd.f32 %v1454_v30, %v1453_v28  ;;  %v1519_v38 = vadd.f32 %v1518_v31, %v1517_v29 }
 0x1fe   : > { %v1216_v39 = vadd.f32 %v1516_v27, %v1119_v36  ;;  %v1122_v40 = vadd.f32 %v1455_v37, %v1988_v34 }
 0x200   : > { %v1254_v41 = vmax.f32 %v1216_v39, 0.0  ;;  %v1219_v42 = vadd.f32 %v1519_v38, %v1122_v40  ;;  %v1456_v43 = vpop.f32.mrb[52].mxu0  ;;  %v1520_v44 = vpop.f32.mrb[52].mxu1 }
 0x201   : > { %v1457_v45 = vpop.f32.mrb[53].mxu0  ;;  %v1521_v46 = vpop.f32.mrb[53].mxu1 }
 0x202   : > { %1270 = vst [vmem:[%s1997_s27 + $0x40] sm:$0xff] %v1254_v41  ;;  %v1255_v47 = vmax.f32 %v1219_v42, 0.0  ;;  %v1458_v48 = vadd.f32 %v1457_v45, %v1456_v43  ;;  %v1522_v49 = vadd.f32 %v1521_v46, %v1520_v44  ;;  %v1459_v50 = vpop.f32.mrb[54].mxu0  ;;  %v1523_v51 = vpop.f32.mrb[54].mxu1 }
 0x203   : > { %v1460_v52 = vpop.f32.mrb[55].mxu0  ;;  %v1524_v53 = vpop.f32.mrb[55].mxu1 }
 0x204   : > { %1271 = vst [vmem:[%s1997_s27 + $0x48] sm:$0xff] %v1255_v47  ;;  %v1127_v54 = vadd.f32 %v1458_v48, %v1988_v34  ;;  %v1461_v55 = vadd.f32 %v1460_v52, %v1459_v50  ;;  %v1525_v56 = vadd.f32 %v1524_v53, %v1523_v51 }
 0x206   : > { %v1224_v57 = vadd.f32 %v1522_v49, %v1127_v54  ;;  %v1130_v58 = vadd.f32 %v1461_v55, %v1988_v34 }
 0x208   : > { %v1256_v59 = vmax.f32 %v1224_v57, 0.0  ;;  %v1227_v60 = vadd.f32 %v1525_v56, %v1130_v58  ;;  %v1462_v61 = vpop.f32.mrb[56].mxu0  ;;  %v1526_v62 = vpop.f32.mrb[56].mxu1 }
 0x209   : > { %v1463_v63 = vpop.f32.mrb[57].mxu0  ;;  %v1527_v0 = vpop.f32.mrb[57].mxu1 }
 0x20a   : > { %1272 = vst [vmem:[%s1997_s27 + $0x50] sm:$0xff] %v1256_v59  ;;  %v1257_v1 = vmax.f32 %v1227_v60, 0.0  ;;  %v1464_v3 = vadd.f32 %v1463_v63, %v1462_v61  ;;  %v1528_v4 = vadd.f32 %v1527_v0, %v1526_v62  ;;  %v1465_v5 = vpop.f32.mrb[58].mxu0  ;;  %v1529_v6 = vpop.f32.mrb[58].mxu1 }
 0x20b   : > { %v1466_v7 = vpop.f32.mrb[59].mxu0  ;;  %v1530_v8 = vpop.f32.mrb[59].mxu1 }
 0x20c   : > { %1273 = vst [vmem:[%s1997_s27 + $0x58] sm:$0xff] %v1257_v1  ;;  %v1135_v9 = vadd.f32 %v1464_v3, %v1988_v34  ;;  %v1467_v10 = vadd.f32 %v1466_v7, %v1465_v5  ;;  %v1531_v11 = vadd.f32 %v1530_v8, %v1529_v6 }
 0x20e   : > { %v1232_v12 = vadd.f32 %v1528_v4, %v1135_v9  ;;  %v1138_v13 = vadd.f32 %v1467_v10, %v1988_v34 }
 0x210   : > { %v1258_v14 = vmax.f32 %v1232_v12, 0.0  ;;  %v1235_v32 = vadd.f32 %v1531_v11, %v1138_v13  ;;  %v1468_v15 = vpop.f32.mrb[60].mxu0  ;;  %v1532_v33 = vpop.f32.mrb[60].mxu1 }
 0x211   : > { %v1469_v16 = vpop.f32.mrb[61].mxu0  ;;  %v1533_v35 = vpop.f32.mrb[61].mxu1 }
 0x212   : > { %1274 = vst [vmem:[%s1997_s27 + $0x60] sm:$0xff] %v1258_v14  ;;  %v1259_v17 = vmax.f32 %v1235_v32, 0.0  ;;  %v1470_v18 = vadd.f32 %v1469_v16, %v1468_v15  ;;  %v1534_v19 = vadd.f32 %v1533_v35, %v1532_v33  ;;  %v1471_v20 = vpop.f32.mrb[62].mxu0  ;;  %v1535_v21 = vpop.f32.mrb[62].mxu1 }
 0x213   : > { %v1472_v22 = vpop.f32.mrb[63].mxu0  ;;  %v1536_v23 = vpop.f32.mrb[63].mxu1 }
 0x214   : > { %1275 = vst [vmem:[%s1997_s27 + $0x68] sm:$0xff] %v1259_v17  ;;  %v1143_v24 = vadd.f32 %v1470_v18, %v1988_v34  ;;  %v1473_v2 = vadd.f32 %v1472_v22, %v1471_v20  ;;  %v1537_v25 = vadd.f32 %v1536_v23, %v1535_v21 }
 0x216   : > { %v1240_v26 = vadd.f32 %v1534_v19, %v1143_v24  ;;  %v1146_v27 = vadd.f32 %v1473_v2, %v1988_v34 }
 0x218   : > { %v1260_v28 = vmax.f32 %v1240_v26, 0.0  ;;  %v1243_v29 = vadd.f32 %v1537_v25, %v1146_v27 }
 0x21a   : > { %1276 = vst [vmem:[%s1997_s27 + $0x70] sm:$0xff] %v1260_v28  ;;  %v1261_v30 = vmax.f32 %v1243_v29, 0.0 }
 0x21c   : > { %1277 = vst [vmem:[%s1997_s27 + $0x78] sm:$0xff] %v1261_v30 }
 0x21d PF: > { %s15_s18 = sadd.s32 1, %s1633_s18  }
 0x21e   : > { %p12_p4 = scmp.ge.s32.totalorder %s15_s18, 6  }
 0x220   :  { %14 = sbr.rel (!%p12_p4) target bundleno = 1 (0x1), region = 70 }

</bundles_post_ra>
